<compile_context>
chip_gen: v6e
topology: v6e:2x2x1
jax: 0.10.0
libtpu: 0.0.40
codegen_flags: <defaults>
</compile_context>

<pallas_src>
import jax
import jax.numpy as jnp
from jax.experimental import pallas as pl
from jax.experimental.pallas import tpu as pltpu

# True model dims (PyTorch spec)
INPUT_SIZE = 400      # multiple of 16 -> clean bf16 sublane tiling for w1's K axis
HIDDEN_SIZE = 250
OUT_SIZE = 10
BATCH = 8

# Hardware-friendly padded dims (lane axis multiples of 128)
HID_PAD = 256
OUT_PAD = 128         # one 128-lane vreg; do NOT widen (would only add writeback)

# Batch tiling for the large-batch path
MAX_TILE = 1024       # amortizes ~0.35 us/step; ~5 MiB total VMEM -> safe on v5e too
SMALL_MAX = 512       # at/below this, single no-grid call (all VMEM resident)


def mlp_kernel(x_ref, w1_ref, b1_ref, w2_ref, b2_ref, o_ref):
    # x arrives as raw f32; cast to bf16 on the VPU so the MXU runs its native
    # bf16 path with f32 accumulation (preferred_element_type).
    x = x_ref[...].astype(jnp.bfloat16)
    h = jnp.dot(x, w1_ref[...], preferred_element_type=jnp.float32)
    h = jnp.maximum(h + b1_ref[...], 0.0)                      # fused bias + ReLU
    y = jnp.dot(h.astype(jnp.bfloat16), w2_ref[...],
                preferred_element_type=jnp.float32)
    # bf16 writeback halves output HBM traffic (only 10 of 128 lanes are real).
    o_ref[...] = (y + b2_ref[...]).astype(o_ref.dtype)


def _round_up(n, m):
    return ((n + m - 1) // m) * m


def simple_nn_forward(x, w1p, b1p, w2p, b2p):
    """x: (B, INPUT_SIZE) f32. Params from init_params. Returns (B, OUT_SIZE) f32."""
    B, F = x.shape
    assert F == INPUT_SIZE

    if B <= SMALL_MAX:
        # Small-batch path: one invocation, no grid, no pipeline machinery,
        # no wrapper pad/cast; whole working set (<1 MiB) lives in VMEM.
        out = pl.pallas_call(
            mlp_kernel,
            out_shape=jax.ShapeDtypeStruct((B, OUT_PAD), jnp.bfloat16),
            in_specs=[pl.BlockSpec(memory_space=pltpu.MemorySpace.VMEM)] * 5,
            out_specs=pl.BlockSpec(memory_space=pltpu.MemorySpace.VMEM),
        )(x, w1p, b1p, w2p, b2p)
    else:
        # Large-batch path: batch-tiled grid with weights VMEM-resident via
        # constant index_maps.  The grid is forced to an EVEN number of tiles
        # so v7x's two TensorCores get equal work from the "parallel" axis,
        # with tiles as close to MAX_TILE as possible (and minimal row padding)
        # to amortize per-step overhead and keep DMAs large.
        n_tiles = max(2, 2 * pl.cdiv(pl.cdiv(B, MAX_TILE), 2))   # even
        tile = _round_up(pl.cdiv(B, n_tiles), 16)                # bf16-safe sublane count
        Bp = n_tiles * tile
        xp = jnp.pad(x, ((0, Bp - B), (0, 0))) if Bp != B else x  # single pad, rows only
        out = pl.pallas_call(
            mlp_kernel,
            out_shape=jax.ShapeDtypeStruct((Bp, OUT_PAD), jnp.bfloat16),
            grid=(n_tiles,),
            in_specs=[
                pl.BlockSpec((tile, INPUT_SIZE), lambda i: (i, 0)),
                # Weights/biases: constant index_map -> fetched once, resident
                # across the grid.  (Buffered(1) hygiene unnecessary: their
                # double-buffers cost <0.6 MiB, far under all scoped VMEM limits.)
                pl.BlockSpec((INPUT_SIZE, HID_PAD), lambda i: (0, 0)),
                pl.BlockSpec((1, HID_PAD), lambda i: (0, 0)),
                pl.BlockSpec((HID_PAD, OUT_PAD), lambda i: (0, 0)),
                pl.BlockSpec((1, OUT_PAD), lambda i: (0, 0)),
            ],
            out_specs=pl.BlockSpec((tile, OUT_PAD), lambda i: (i, 0)),
            compiler_params=pltpu.CompilerParams(
                dimension_semantics=("parallel",)),
        )(xp, w1p, b1p, w2p, b2p)

    # Slice out the 10 real logits; tiny (B, 10) result cast back to f32.
    return out[:B, :OUT_SIZE].astype(jnp.float32)


def init_params(key):
    """PyTorch-Linear-style init U(-1/sqrt(fan_in), 1/sqrt(fan_in)); weights stored
    bf16 with (in, out) layout (kernel computes x @ W), out-features zero-padded
    to lane multiples; K of fc1 kept at the true 400 (no K padding)."""
    k1, k2, k3, k4 = jax.random.split(key, 4)
    bound1 = 1.0 / jnp.sqrt(INPUT_SIZE)
    bound2 = 1.0 / jnp.sqrt(HIDDEN_SIZE)
    w1 = jax.random.uniform(k1, (INPUT_SIZE, HIDDEN_SIZE), jnp.float32, -bound1, bound1)
    b1 = jax.random.uniform(k2, (1, HIDDEN_SIZE), jnp.float32, -bound1, bound1)
    w2 = jax.random.uniform(k3, (HIDDEN_SIZE, OUT_SIZE), jnp.float32, -bound2, bound2)
    b2 = jax.random.uniform(k4, (1, OUT_SIZE), jnp.float32, -bound2, bound2)

    w1p = jnp.pad(w1, ((0, 0), (0, HID_PAD - HIDDEN_SIZE))).astype(jnp.bfloat16)
    b1p = jnp.pad(b1, ((0, 0), (0, HID_PAD - HIDDEN_SIZE)))
    w2p = jnp.pad(w2, ((0, HID_PAD - HIDDEN_SIZE), (0, OUT_PAD - OUT_SIZE))).astype(jnp.bfloat16)
    b2p = jnp.pad(b2, ((0, 0), (0, OUT_PAD - OUT_SIZE)))
    return w1p, b1p, w2p, b2p


def reference(x, w1p, b1p, w2p, b2p):
    """Pure-JAX reference mirroring the kernel's bf16-input / f32-accumulate /
    bf16-writeback numerics."""
    xb = x.astype(jnp.bfloat16).astype(jnp.float32)
    h = xb @ w1p.astype(jnp.float32) + b1p
    h = jnp.maximum(h, 0.0)
    y = h.astype(jnp.bfloat16).astype(jnp.float32) @ w2p.astype(jnp.float32) + b2p
    y = y.astype(jnp.bfloat16).astype(jnp.float32)
    return y[:, :OUT_SIZE]


if __name__ == "__main__":
    key = jax.random.PRNGKey(0)
    kx, kp, kx2 = jax.random.split(key, 3)
    w1p, b1p, w2p, b2p = init_params(kp)
    fwd = jax.jit(simple_nn_forward)

    # Small-batch (single-invocation, no-grid) path
    x = jax.random.normal(kx, (BATCH, INPUT_SIZE), jnp.float32)
    out = jax.block_until_ready(fwd(x, w1p, b1p, w2p, b2p))
    ref = reference(x, w1p, b1p, w2p, b2p)
    assert out.shape == (BATCH, OUT_SIZE)
    assert jnp.allclose(out, ref, atol=1e-2, rtol=1e-2)

    # Large-batch (batch-tiled, even grid -> megacore-friendly) path
    BIG = 600
    xb = jax.random.normal(kx2, (BIG, INPUT_SIZE), jnp.float32)
    out_b = jax.block_until_ready(fwd(xb, w1p, b1p, w2p, b2p))
    ref_b = reference(xb, w1p, b1p, w2p, b2p)
    assert out_b.shape == (BIG, OUT_SIZE)
    assert jnp.allclose(out_b, ref_b, atol=1e-2, rtol=1e-2)

    print("KERNEL_OK")
</pallas_src>

<mosaic_0001>
module attributes {stable_mosaic.version = 11 : i64} {
  func.func @mlp_kernel(%arg0: memref<8x400xf32, #tpu.memory_space<vmem>>, %arg1: memref<400x256xbf16, #tpu.memory_space<vmem>>, %arg2: memref<1x256xf32, #tpu.memory_space<vmem>>, %arg3: memref<256x128xbf16, #tpu.memory_space<vmem>>, %arg4: memref<1x128xf32, #tpu.memory_space<vmem>>, %arg5: memref<8x128xbf16, #tpu.memory_space<vmem>>) attributes {dimension_semantics = [], scalar_prefetch = 0 : i64, scratch_operands = 0 : i64, tpu.core_type = #tpu.core_type<tc>} {
    %c0 = arith.constant 0 : index
    %c0_0 = arith.constant 0 : index
    %0 = vector.load %arg0[%c0, %c0_0] : memref<8x400xf32, #tpu.memory_space<vmem>>, vector<8x400xf32>
    %1 = arith.truncf %0 : vector<8x400xf32> to vector<8x400xbf16>
    %c0_1 = arith.constant 0 : index
    %c0_2 = arith.constant 0 : index
    %2 = vector.load %arg1[%c0_1, %c0_2] : memref<400x256xbf16, #tpu.memory_space<vmem>>, vector<400x256xbf16>
    %cst = arith.constant dense<0.000000e+00> : vector<8x256xf32>
    %3 = tpu.matmul %1, %2, %cst {dimension_numbers = #tpu.dot_dimension_numbers<[1], [0], [0], [1], [0, 0, 1, 1], [], []>} : vector<8x400xbf16>, vector<400x256xbf16>, vector<8x256xf32> -> vector<8x256xf32>
    %c0_3 = arith.constant 0 : index
    %c0_4 = arith.constant 0 : index
    %4 = vector.load %arg2[%c0_3, %c0_4] : memref<1x256xf32, #tpu.memory_space<vmem>>, vector<1x256xf32>
    %5 = vector.broadcast %4 : vector<1x256xf32> to vector<8x256xf32>
    %6 = arith.addf %3, %5 : vector<8x256xf32>
    %cst_5 = arith.constant 0.000000e+00 : f32
    %7 = vector.broadcast %cst_5 : f32 to vector<8x256xf32>
    %8 = arith.maximumf %6, %7 : vector<8x256xf32>
    %9 = arith.truncf %8 : vector<8x256xf32> to vector<8x256xbf16>
    %c0_6 = arith.constant 0 : index
    %c0_7 = arith.constant 0 : index
    %10 = vector.load %arg3[%c0_6, %c0_7] : memref<256x128xbf16, #tpu.memory_space<vmem>>, vector<256x128xbf16>
    %cst_8 = arith.constant dense<0.000000e+00> : vector<8x128xf32>
    %11 = tpu.matmul %9, %10, %cst_8 {dimension_numbers = #tpu.dot_dimension_numbers<[1], [0], [0], [1], [0, 0, 1, 1], [], []>} : vector<8x256xbf16>, vector<256x128xbf16>, vector<8x128xf32> -> vector<8x128xf32>
    %c0_9 = arith.constant 0 : index
    %c0_10 = arith.constant 0 : index
    %12 = vector.load %arg4[%c0_9, %c0_10] : memref<1x128xf32, #tpu.memory_space<vmem>>, vector<1x128xf32>
    %13 = vector.broadcast %12 : vector<1x128xf32> to vector<8x128xf32>
    %14 = arith.addf %11, %13 : vector<8x128xf32>
    %15 = arith.truncf %14 : vector<8x128xf32> to vector<8x128xbf16>
    %c0_11 = arith.constant 0 : index
    %c0_12 = arith.constant 0 : index
    %16 = vector.load %arg5[%c0_11, %c0_12] : memref<8x128xbf16, #tpu.memory_space<vmem>>, vector<8x128xbf16>
    tpu.vector_store %arg5[%c0_11, %c0_12], %15 {strides = array<i32>} : memref<8x128xbf16, #tpu.memory_space<vmem>>, vector<8x128xbf16>,
    return
  }
}

</mosaic_0001>

<bundles_post_ra>
// kernel: simple_nn_forward.1
= control target key start
LH: loop header
LB: loop body
LE: loop exit
PB: predicated region body
PF: predicated region fallthrough
CT: control target
= control target key end

     0   :  { %10 = vsyncpa [#allocation3], 0  ;;  %s960_s0 = inlined_call_operand.hbm [shape: f32[8,400], index: 0, kind: input, shape index: {}]   ;;  %s961_s1 = inlined_call_operand.hbm [shape: bf16[400,256], index: 1, kind: input, shape index: {}]   ;;  %s962_s2 = inlined_call_operand.vmem [shape: f32[1,256], index: 2, kind: input, shape index: {}]   ;;  %s963_s3 = inlined_call_operand.hbm [shape: bf16[256,128], index: 3, kind: input, shape index: {}]   ;;  %s964_s4 = inlined_call_operand.vmem [shape: f32[1,128], index: 4, kind: input, shape index: {}]   ;;  %s965_s5 = inlined_call_operand.vmem [shape: bf16[8,128], index: 5, kind: output, shape index: {}]  }
   0x1   :  { %11 = vsyncpa [#allocation5], 0  ;;  %s905_s18 = smov [#allocation4]  }
   0x2   :  { %s27_s19 = sshll.u32 %s905_s18, 4  ;;  %s28_s19 = int_to_ptr.vmem [resolvable:$true] %s27_s19 }
   0x3   :  { %s849_s20 = scalar_lea.vmem %s28_s19, 6400  ;;  %p854_p1 = scmp.lt.s32.totalorder %s28_s19, %s28_s19 }
   0x4   :  { %p850_p0 = scmp.ne.s32.totalorder %s28_s19, %s849_s20  ;;  %p855_p2 = scmp.lt.s32.totalorder %s849_s20, %s849_s20 }
   0x6   :  { %p856_p3 = por %p855_p2, %p854_p1 }
   0x8   :  { %p857_p4 = pnand %p856_p3, %p850_p0 }
   0xa   :  { %860 = shalt.err (!%p857_p4)
}
   0xb   :  { %s906_s21 = smov 128   ;;  %s907_s22 = smov 8  }
   0xc   :  { %33 = dma.hbm_to_vmem [thread:$0]  %s961_s1, 6400, %s28_s19, [#allocation5], %s906_s21, %s906_s21, %s907_s22  }
   0xd   :  { %s908_s25 = smov [#allocation2]   ;;  %s909_s27 = smov [#allocation6]  }
   0xe   :  { %s18_s26 = sshll.u32 %s908_s25, 4  ;;  %s41_s28 = sshll.u32 %s909_s27, 4  ;;  %s19_s26 = int_to_ptr.vmem [resolvable:$true] %s18_s26  ;;  %s42_s28 = int_to_ptr.vmem [resolvable:$true] %s41_s28 }
   0xf   :  { %s869_s29 = scalar_lea.vmem %s19_s26, 512  ;;  %p874_p6 = scmp.lt.s32.totalorder %s19_s26, %s19_s26 }
  0x10   :  { %p870_p5 = scmp.ne.s32.totalorder %s19_s26, %s869_s29  ;;  %p875_p7 = scmp.lt.s32.totalorder %s869_s29, %s869_s29 }
  0x12   :  { %p876_p8 = por %p875_p7, %p874_p6 }
  0x14   :  { %p877_p9 = pnand %p876_p8, %p870_p5 }
  0x16   :  { %880 = shalt.err (!%p877_p9)
}
  0x17   :  { %21 = dma.hbm_to_vmem [thread:$0]  %s960_s0, 512, %s19_s26, [#allocation3]  }
  0x18   :  { %s889_s7 = scalar_lea.vmem %s42_s28, 2048  ;;  %p894_p11 = scmp.lt.s32.totalorder %s42_s28, %s42_s28 }
  0x19   :  { %p890_p10 = scmp.ne.s32.totalorder %s42_s28, %s889_s7  ;;  %p895_p12 = scmp.lt.s32.totalorder %s889_s7, %s889_s7 }
  0x1b   :  { %p896_p13 = por %p895_p12, %p894_p11 }
  0x1d   :  { %p897_p0 = pnand %p896_p13, %p890_p10 }
  0x1f   :  { %900 = shalt.err (!%p897_p0)
}
  0x20   :  { %s910_s1 = smov 64   ;;  %s911_s8 = smov 4  }
  0x21   :  { %47 = dma.hbm_to_vmem [thread:$0]  %s963_s3, 2048, %s42_s28, [#allocation5], %s910_s1, %s910_s1, %s911_s8  }
  0x22   :  { %901 = dma.done.wait [#allocation3], 512  }
  0x23   :  { %902 = vsyncadd [#allocation3], 4294966784 }
  0x24   :  { %903 = dma.done.wait [#allocation5], 8448  }
  0x25   :  { %904 = vsyncadd [#allocation5], 4294958848  ;;  %v750_v0 = vld [vmem:[#allocation4 + $0x74] ss:$8 sps:$4 sm:$0xff]   ;;  %v752_v1 = vld [vmem:[#allocation4 + $0x70] ss:$8 sps:$4 sm:$0xff]  }
  0x26   :  { %384 = vmatprep.subr.bf16.mxu0 %v750_v0  ;;  %v753_v2 = vld [vmem:[#allocation4 + $0x64] ss:$8 sps:$4 sm:$0xff]   ;;  %v755_v3 = vld [vmem:[#allocation4 + $0x60] ss:$8 sps:$4 sm:$0xff]   ;;  %v756_v4 = vld [vmem:[#allocation4 + $0x54] ss:$8 sps:$4 sm:$0xff]  }
  0x27   :  { %385 = vmatpush1.bf16.msra.mxu0 %v752_v1  ;;  %v758_v5 = vld [vmem:[#allocation4 + $0x50] ss:$8 sps:$4 sm:$0xff]   ;;  %v759_v6 = vld [vmem:[#allocation4 + $0x44] ss:$8 sps:$4 sm:$0xff]   ;;  %v770_v7 = vld [vmem:[#allocation4 + $0x174] ss:$8 sps:$4 sm:$0xff]  }
  0x28   :  { %386 = vmatprep.subr.bf16.mxu0 %v753_v2  ;;  %v773_v8 = vld [vmem:[#allocation4 + $0x170] ss:$8 sps:$4 sm:$0xff]   ;;  %v761_v9 = vld [vmem:[#allocation4 + $0x40] ss:$8 sps:$4 sm:$0xff]   ;;  %425 = vmatprep.subr.bf16.mxu1 %v770_v7  ;;  %v762_v10 = vld [vmem:[#allocation4 + $0x34] ss:$8 sps:$4 sm:$0xff]  }
  0x29   :  { %426 = vmatpush1.bf16.msra.mxu1 %v773_v8  ;;  %v776_v11 = vld [vmem:[#allocation4 + $0x164] ss:$8 sps:$4 sm:$0xff]   ;;  %v779_v12 = vld [vmem:[#allocation4 + $0x160] ss:$8 sps:$4 sm:$0xff]   ;;  %v764_v13 = vld [vmem:[#allocation4 + $0x30] ss:$8 sps:$4 sm:$0xff]  }
  0x2a   :  { %427 = vmatprep.subr.bf16.mxu1 %v776_v11  ;;  %v765_v14 = vld [vmem:[#allocation4 + $0x24] ss:$8 sps:$4 sm:$0xff]   ;;  %v782_v15 = vld [vmem:[#allocation4 + $0x154] ss:$8 sps:$4 sm:$0xff]   ;;  %v785_v16 = vld [vmem:[#allocation4 + $0x150] ss:$8 sps:$4 sm:$0xff]  }
  0x2b   :  { %387 = vmatpush1.bf16.msra.mxu0 %v755_v3  ;;  %v788_v17 = vld [vmem:[#allocation4 + $0x144] ss:$8 sps:$4 sm:$0xff]   ;;  %v767_v18 = vld [vmem:[#allocation4 + $0x20] ss:$8 sps:$4 sm:$0xff]   ;;  %v768_v19 = vld [vmem:[#allocation4 + $0x14] ss:$8 sps:$4 sm:$0xff]  }
  0x2c   :  { %388 = vmatprep.subr.bf16.mxu0 %v756_v4  ;;  %v791_v20 = vld [vmem:[#allocation4 + $0x140] ss:$8 sps:$4 sm:$0xff]   ;;  %v794_v21 = vld [vmem:[#allocation4 + $0x134] ss:$8 sps:$4 sm:$0xff]   ;;  %v772_v22 = vld [vmem:[#allocation4 + $0x10] ss:$8 sps:$4 sm:$0xff]  }
  0x2d   :  { %428 = vmatpush1.bf16.msra.mxu1 %v779_v12  ;;  %v774_v23 = vld [vmem:[#allocation4 + $0x4] ss:$8 sps:$4 sm:$0xff]   ;;  %v797_v24 = vld [vmem:[#allocation4 + $0x130] ss:$8 sps:$4 sm:$0xff]   ;;  %v778_v26 = vld [vmem:[#allocation4] ss:$8 sps:$4 sm:$0xff]   ;;  %v120_v12 = vlaneseq }
  0x2e   :  { %429 = vmatprep.subr.bf16.mxu1 %v782_v15  ;;  %v800_v25 = vld [vmem:[#allocation4 + $0x124] ss:$8 sps:$4 sm:$0xff]   ;;  %v780_v27 = vld [vmem:[#allocation4 + $0xf4] ss:$8 sps:$4 sm:$0xff]   ;;  %v803_v28 = vld [vmem:[#allocation4 + $0x120] ss:$8 sps:$4 sm:$0xff]  }
  0x2f   :  { %389 = vmatpush1.bf16.msra.mxu0 %v758_v5  ;;  %v806_v29 = vld [vmem:[#allocation4 + $0x114] ss:$8 sps:$4 sm:$0xff]   ;;  %v784_v30 = vld [vmem:[#allocation4 + $0xf0] ss:$8 sps:$4 sm:$0xff]   ;;  %v786_v31 = vld [vmem:[#allocation4 + $0xe4] ss:$8 sps:$4 sm:$0xff]  }
  0x30   :  { %390 = vmatprep.subr.bf16.mxu0 %v759_v6  ;;  %v809_v32 = vld [vmem:[#allocation4 + $0x110] ss:$8 sps:$4 sm:$0xff]   ;;  %vm380_vm0 = vcmask 130048   ;;  %v812_v34 = vld [vmem:[#allocation4 + $0x104] ss:$8 sps:$4 sm:$0xff]   ;;  %v121_v15 = vshrl.u32 %v120_v12, 7 }
  0x31   :  { %430 = vmatpush1.bf16.msra.mxu1 %v785_v16  ;;  %v63_v33 = vld [vmem:[#allocation2 + $0x18] sm:$0xff]  ;;  %v790_v36 = vld [vmem:[#allocation4 + $0xe0] ss:$8 sps:$4 sm:$0xff]   ;;  %v818_v42 = vld [vmem:[#allocation4 + $0x184] ss:$8 sps:$4 sm:$0xff]  }
  0x32   :  { %431 = vmatprep.subr.bf16.mxu1 %v788_v17  ;;  %v67_v35 = vpack.c.bf16 %v63_v33, %v63_v33  ;;  %v61_v37 = vld [vmem:[#allocation2 + $0x8] sm:$0xff]  ;;  %v792_v38 = vld [vmem:[#allocation4 + $0xd4] ss:$8 sps:$4 sm:$0xff]   ;;  %v796_v41 = vld [vmem:[#allocation4 + $0xd0] ss:$8 sps:$4 sm:$0xff]   ;;  %v122_v16 = vsub.s32 0, %v121_v15 }
  0x33   :  { %391 = vmatpush1.bf16.msra.mxu0 %v761_v9  ;;  %v65_v39 = vpack.c.bf16 %v61_v37, %v61_v37  ;;  %v815_v40 = vld [vmem:[#allocation4 + $0x100] ss:$8 sps:$4 sm:$0xff]   ;;  %v798_v43 = vld [vmem:[#allocation4 + $0xc4] ss:$8 sps:$4 sm:$0xff]   ;;  %v62_v45 = vld [vmem:[#allocation2 + $0x10] sm:$0xff] }
  0x34   :  { %392 = vmatprep.subr.bf16.mxu0 %v762_v10  ;;  %703 = vmatprep.mubr.msk.bf16.mxu1 %vm380_vm0, %v67_v35  ;;  %v821_v44 = vld [vmem:[#allocation4 + $0x180] ss:$8 sps:$4 sm:$0xff]   ;;  %v804_v48 = vld [vmem:[#allocation4 + $0xb4] ss:$8 sps:$4 sm:$0xff]   ;;  %v66_v50 = vpack.c.bf16 %v62_v45, %v62_v45  ;;  %v808_v52 = vld [vmem:[#allocation4 + $0xb0] ss:$8 sps:$4 sm:$0xff]  }
  0x35   :  { %432 = vmatpush1.bf16.msra.mxu1 %v791_v20  ;;  %416 = vmatprep.mubr.bf16.mxu0 %v65_v39  ;;  %v802_v46 = vld [vmem:[#allocation4 + $0xc0] ss:$8 sps:$4 sm:$0xff]   ;;  %v810_v53 = vld [vmem:[#allocation4 + $0xa4] ss:$8 sps:$4 sm:$0xff]   ;;  %v829_v55 = vld [vmem:[#allocation6 + $0x68] sm:$0xff]  }
  0x36   :  { %433 = vmatprep.subr.bf16.mxu1 %v794_v21  ;;  %v825_v47 = vld [vmem:[#allocation6 + $0x78] sm:$0xff]   ;;  %v827_v51 = vld [vmem:[#allocation6 + $0x70] sm:$0xff]   ;;  %v816_v57 = vld [vmem:[#allocation4 + $0x94] ss:$8 sps:$4 sm:$0xff]  }
  0x37   :  { %393 = vmatpush1.bf16.msra.mxu0 %v764_v13  ;;  %v826_v49 = vld [vmem:[#allocation6 + $0x38] sm:$0xff]   ;;  %v828_v54 = vld [vmem:[#allocation6 + $0x30] sm:$0xff]   ;;  %v830_v58 = vld [vmem:[#allocation6 + $0x28] sm:$0xff]  }
  0x38   :  { %394 = vmatprep.subr.bf16.mxu0 %v765_v14  ;;  %v814_v56 = vld [vmem:[#allocation4 + $0xa0] ss:$8 sps:$4 sm:$0xff]   ;;  %v831_v59 = vld [vmem:[#allocation6 + $0x60] sm:$0xff]   ;;  %v822_v61 = vld [vmem:[#allocation4 + $0x84] ss:$8 sps:$4 sm:$0xff]  }
  0x39   :  { %434 = vmatpush1.bf16.msra.mxu1 %v797_v24  ;;  %v820_v60 = vld [vmem:[#allocation4 + $0x90] ss:$8 sps:$4 sm:$0xff]   ;;  %v824_v63 = vld [vmem:[#allocation4 + $0x80] ss:$8 sps:$4 sm:$0xff]  }
  0x3a   :  { %435 = vmatprep.subr.bf16.mxu1 %v800_v25  ;;  %v832_v62 = vld [vmem:[#allocation6 + $0x20] sm:$0xff]   ;;  %v60_v0 = vld [vmem:[#allocation2] sm:$0xff]  ;;  %v833_v2 = vld [vmem:[#allocation6 + $0x58] sm:$0xff]  }
  0x3b   :  { %395 = vmatpush1.bf16.msra.mxu0 %v767_v18  ;;  %v64_v1 = vpack.c.bf16 %v60_v0, %v60_v0  ;;  %v834_v3 = vld [vmem:[#allocation6 + $0x18] sm:$0xff]   ;;  %v835_v4 = vld [vmem:[#allocation6 + $0x50] sm:$0xff]   ;;  %v837_v6 = vld [vmem:[#allocation6 + $0x48] sm:$0xff]   ;;  %v126_v18 = vsub.s32 1, %v121_v15 }
  0x3c   :  { %396 = vmatprep.subr.bf16.mxu0 %v768_v19  ;;  %v836_v5 = vld [vmem:[#allocation6 + $0x10] sm:$0xff]   ;;  %v838_v7 = vld [vmem:[#allocation6 + $0x8] sm:$0xff]   ;;  %v839_v8 = vld [vmem:[#allocation6 + $0x40] sm:$0xff]  }
  0x3d   :  { %436 = vmatpush1.bf16.msra.mxu1 %v803_v28  ;;  %v840_v9 = vld [vmem:[#allocation6] sm:$0xff]   ;;  %v118_v17 = vld [vmem:[%s962_s2] sm:$0x3] }
  0x3e   :  { %437 = vmatprep.subr.bf16.mxu1 %v806_v29  ;;  %v123_v19 = vrot.slane %v118_v17, %v122_v16  ;;  %v127_v20 = vrot.slane %v118_v17, %v126_v18 }
  0x3f   :  { %397 = vmatpush1.bf16.msra.mxu0 %v772_v22 }
  0x40   :  { %398 = vmatprep.subr.bf16.mxu0 %v774_v23 }
  0x41   :  { %438 = vmatpush1.bf16.msra.mxu1 %v809_v32 }
  0x42   :  { %439 = vmatprep.subr.bf16.mxu1 %v812_v34  ;;  %v704_v34 = vld [vmem:[%s964_s4] ss:$0 sm:$0xff] }
  0x43   :  { %399 = vmatpush1.bf16.msra.mxu0 %v778_v26 }
  0x44   :  { %400 = vmatprep.subr.bf16.mxu0 %v780_v27 }
  0x45   :  { %440 = vmatpush1.bf16.msra.mxu1 %v815_v40 }
  0x46   :  { %455 = vmatprep.subr.bf16.mxu1 %v818_v42 }
  0x47   :  { %401 = vmatpush2.bf16.msra.mxu0 %v784_v30 }
  0x48   :  { %402 = vmatprep.subr.bf16.mxu0 %v786_v31 }
  0x49   :  { %456 = vmatpush2.bf16.msra.mxu1 %v821_v44 }
  0x4a   :  { %721 = vmatprep.subr.bf16.mxu1 %v825_v47 }
  0x4b   :  { %403 = vmatpush2.bf16.msra.mxu0 %v790_v36 }
  0x4c   :  { %404 = vmatprep.subr.bf16.mxu0 %v792_v38  ;;  %458 = vmatmul.mubr.bf16.vlgmr.msra.gmra.mxu1 %v66_v50 }
  0x4d   :  { %722 = vmatpush3.bf16.msra.mxu1 %v826_v49 }
  0x4e   :  { %723 = vmatprep.subr.bf16.mxu1 %v827_v51 }
  0x4f   :  { %405 = vmatpush2.bf16.msra.mxu0 %v796_v41 }
  0x50   :  { %406 = vmatprep.subr.bf16.mxu0 %v798_v43 }
  0x51   :  { %724 = vmatpush3.bf16.msra.mxu1 %v828_v54 }
  0x52   :  { %725 = vmatprep.subr.bf16.mxu1 %v829_v55 }
  0x53   :  { %407 = vmatpush2.bf16.msra.mxu0 %v802_v46 }
  0x54   :  { %408 = vmatprep.subr.bf16.mxu0 %v804_v48 }
  0x55   :  { %726 = vmatpush3.bf16.msra.mxu1 %v830_v58 }
  0x56   :  { %727 = vmatprep.subr.bf16.mxu1 %v831_v59 }
  0x57   :  { %409 = vmatpush2.bf16.msra.mxu0 %v808_v52 }
  0x58   :  { %410 = vmatprep.subr.bf16.mxu0 %v810_v53 }
  0x59   :  { %728 = vmatpush3.bf16.msra.mxu1 %v832_v62 }
  0x5a   :  { %729 = vmatprep.subr.bf16.mxu1 %v833_v2 }
  0x5b   :  { %411 = vmatpush2.bf16.msra.mxu0 %v814_v56 }
  0x5c   :  { %412 = vmatprep.subr.bf16.mxu0 %v816_v57 }
  0x5d   :  { %730 = vmatpush3.bf16.msra.mxu1 %v834_v3 }
  0x5e   :  { %731 = vmatprep.subr.bf16.mxu1 %v835_v4 }
  0x5f   :  { %413 = vmatpush2.bf16.msra.mxu0 %v820_v60 }
  0x60   :  { %414 = vmatprep.subr.bf16.mxu0 %v822_v61 }
  0x61   :  { %732 = vmatpush3.bf16.msra.mxu1 %v836_v5 }
  0x62   :  { %733 = vmatprep.subr.bf16.mxu1 %v837_v6 }
  0x63   :  { %415 = vmatpush2.bf16.msra.mxu0 %v824_v63 }
  0x65   :  { %734 = vmatpush3.bf16.msra.mxu1 %v838_v7 }
  0x66   :  { %417 = vmatmul.mubr.bf16.vlgmr.msra.gmra.mxu0 %v64_v1  ;;  %735 = vmatprep.subr.bf16.mxu1 %v839_v8 }
  0x69   :  { %736 = vmatpush3.bf16.msra.mxu1 %v840_v9 }
 0x10c   :  { %v459_v10 = vpop.f32.mrf.mxu1 }
 0x10e   :  { %v461_v11 = vpop.f32.mrf.mxu1 }
 0x110   :  { %v463_v13 = vpop.f32.mrf.mxu1 }
 0x112   :  { %v464_v14 = vpop.f32.mrf.mxu1 }
 0x126   :  { %v418_v21 = vpop.f32.mrf.mxu0 }
 0x127   :  { %v419_v22 = vadd.f32 %v418_v21, %v123_v19 }
 0x128   :  { %v420_v23 = vpop.f32.mrf.mxu0 }
 0x129   :  { %v460_v24 = vadd.f32 %v459_v10, %v419_v22  ;;  %v421_v25 = vadd.f32 %v420_v23, %v127_v20 }
 0x12a   :  { %v422_v26 = vpop.f32.mrf.mxu0 }
 0x12b   :  { %v462_v27 = vadd.f32 %v461_v11, %v421_v25  ;;  %v466_v28 = vmax.f32 %v460_v24, 0.0 }
 0x12c   :  { %v423_v29 = vpop.f32.mrf.mxu0 }
 0x12d   :  { %v467_v30 = vmax.f32 %v462_v27, 0.0  ;;  %v468_v32 = vpack.c.bf16 %v466_v28, %v466_v28 }
 0x12f   :  { %v469_v31 = vpack.c.bf16 %v467_v30, %v467_v30 }
 0x131   :  { %637 = vmatprep.mubr.bf16.mxu1 %v469_v31 }
 0x132   :  { %638 = vmatmul.mubr.bf16.vlgmr.msra.gmra.mxu1 %v468_v32 }
 0x1f2   :  { %v737_v33 = vpop.f32.mrf.mxu1 }
 0x1f4   :  { %v738_v35 = vpop.f32.mrf.mxu1 }
 0x1f5   :  { %v739_v36 = vadd.f32 %v738_v35, %v737_v33 }
 0x1f6   :  { %v740_v37 = vpop.f32.mrf.mxu1 }
 0x1f7   :  { %v640_v38 = vadd.f32 %v739_v36, %v704_v34 }
 0x1f8   :  { %v741_v39 = vpop.f32.mrf.mxu1 }
 0x1f9   :  { %v645_v40 = vpack.c.bf16 %v640_v38, %v640_v38 }
 0x1fb   :  { %646 = vst [vmem:[%s965_s5] sm:$0xf] %v645_v40 }
 0x1fc   :  { %651 = vsyncpa [#allocation3], 1 }
 0x1fd   :  { %652 = vsyncpa [#allocation5], 1 }

</bundles_post_ra>
